<compile_context>
chip_gen: v7x
topology: tpu7x:2x2x1
jax: 0.10.0
libtpu: 0.0.40
codegen_flags: <defaults>
</compile_context>

<pallas_src>
import jax
import jax.numpy as jnp
from jax.experimental import pallas as pl
from jax.experimental.pallas import tpu as pltpu


def _make_tbnn_kernel(n_hidden):
    def kernel(*refs):
        x_ref = refs[0]
        hidden_refs = refs[1:1 + 2 * n_hidden]
        (wg_ref, bg_ref, e_ref, s_ref, g_ref, tn_ref, out_ref) = refs[1 + 2 * n_hidden:]

        # --- tiny MLP (MXU is nearly idle; no padding games needed) ---
        h = x_ref[...]
        for k in range(n_hidden):
            w = hidden_refs[2 * k][...]
            b = hidden_refs[2 * k + 1][...]
            h = jnp.dot(h, w, preferred_element_type=jnp.float32) + b
            h = jnp.maximum(h, 0.0)  # activation_function = ReLU

        gn = jnp.dot(h, wg_ref[...], preferred_element_type=jnp.float32) + bg_ref[...]

        # --- tensor-basis contraction, all lane-dense 2-D ---
        tn = tn_ref[...].astype(jnp.float32)          # (TB, N*9), f32 accumulation
        # gn_exp[b, n*9+j] = gn[b, n]   (MXU broadcast via 0/1 expansion matrix)
        gn_exp = jnp.dot(gn, e_ref[...], preferred_element_type=jnp.float32)
        weighted = gn_exp * tn                         # (TB, N*9) VPU FMA region
        # out[:, 0:9]   = sum_n weighted[:, n*9:(n+1)*9]   (via S)
        # out[:, 9:9+N] = gn                               (via G)
        out_ref[...] = (jnp.dot(weighted, s_ref[...], preferred_element_type=jnp.float32)
                        + jnp.dot(gn, g_ref[...], preferred_element_type=jnp.float32))

    return kernel


def tbnn_forward(x, hidden_params, wg, bg, tn, *, block_b=4096,
                 stream_dtype=jnp.bfloat16, min_grid_steps=4):
    """x: (B, input_dim); hidden_params: list of (W_(in,out), b_(1,out));
    wg: (neurons, N); bg: (1, N); tn: (B, N, 3, 3).  Returns (b_pred, gn).

    stream_dtype controls the Tn HBM stream only (accumulation is f32);
    pass jnp.float32 for bit-tight parity with the f32 reference."""
    B = x.shape[0]
    N = wg.shape[1]
    n_hidden = len(hidden_params)
    n9 = N * 9
    out_w = 9 + N            # packed output: b_pred (9 cols) | gn (N cols)

    # --- batch tile: multiple of 8 sublanes, capped so the grid keeps at
    #     least `min_grid_steps` steps (v7x has 2 TCs to feed). ---
    def _round8(n):
        return pl.cdiv(max(n, 1), 8) * 8

    tb = max(8, min(_round8(block_b), _round8(pl.cdiv(B, min_grid_steps))))
    grid = (pl.cdiv(B, tb),)
    # NOTE: for block_b > ~8192 set vmem_limit_bytes in CompilerParams; the
    # default 4096-row tile double-buffered working set is only a few MiB.

    # --- stream inputs directly (no zero-padded HBM copies).  The ragged last
    #     block reads undefined rows; they are row-independent and masked on
    #     write, so nothing invalid ever reaches the (B, out_w) output. ---
    x_f32 = x.astype(jnp.float32)
    tn_stream = tn.reshape(B, n9).astype(stream_dtype)   # no-op if already stream_dtype

    # --- tiny resident 0/1 matrices for the contraction + output packing ---
    # E: (N, N*9), E[n, n*9:(n+1)*9] = 1  -> broadcasts gn over the 9 tensor slots
    e_mat = jnp.repeat(jnp.eye(N, dtype=jnp.float32), 9, axis=1)
    # S: (N*9, out_w), S[n*9+j, j] = 1    -> sums groups of 9 into b_pred cols 0:9
    s_mat = jnp.pad(jnp.tile(jnp.eye(9, dtype=jnp.float32), (N, 1)),
                    ((0, 0), (0, out_w - 9)))
    # G: (N, out_w), G[n, 9+n] = 1        -> copies gn into cols 9:9+N
    g_mat = jnp.pad(jnp.eye(N, dtype=jnp.float32), ((0, 0), (9, 0)))

    const_inputs = []
    for w, b in hidden_params:
        const_inputs.append(w.astype(jnp.float32))
        const_inputs.append(b.astype(jnp.float32))
    const_inputs += [wg.astype(jnp.float32), bg.astype(jnp.float32),
                     e_mat, s_mat, g_mat]

    def const_spec(a):
        # All constants are 2-D and stay VMEM-resident across grid steps.
        return pl.BlockSpec(a.shape, lambda i: (0, 0))

    in_specs = ([pl.BlockSpec((tb, x.shape[1]), lambda i: (i, 0))]
                + [const_spec(a) for a in const_inputs]
                + [pl.BlockSpec((tb, n9), lambda i: (i, 0))])

    out_specs = pl.BlockSpec((tb, out_w), lambda i: (i, 0))
    out_shape = jax.ShapeDtypeStruct((B, out_w), jnp.float32)

    packed = pl.pallas_call(
        _make_tbnn_kernel(n_hidden),
        grid=grid,
        in_specs=in_specs,
        out_specs=out_specs,
        out_shape=out_shape,
        compiler_params=pltpu.CompilerParams(
            dimension_semantics=("parallel",)),   # shards batch tiles across TCs on v7x
    )(x_f32, *const_inputs, tn_stream)

    b_pred = packed[:, :9].reshape(B, 3, 3)
    gn = packed[:, 9:9 + N]
    return b_pred, gn


def _ref_forward(x, hidden_params, wg, bg, tn):
    h = x
    for w, b in hidden_params:
        h = jnp.maximum(h @ w + b, 0.0)
    gn = h @ wg + bg
    b_pred = jnp.sum(gn[:, :, None, None] * tn, axis=1)
    return b_pred, gn


def _run_case(key, B, input_dim, n_hidden, neurons, N, block_b,
              stream_dtype, b_tol, gn_tol):
    keys = jax.random.split(key, 2 * n_hidden + 4)

    hidden_params = []
    d_in = input_dim
    for k in range(n_hidden):
        w = 0.1 * jax.random.normal(keys[2 * k], (d_in, neurons), jnp.float32)
        b = 0.1 * jax.random.normal(keys[2 * k + 1], (1, neurons), jnp.float32)
        hidden_params.append((w, b))
        d_in = neurons

    wg = 0.1 * jax.random.normal(keys[2 * n_hidden], (neurons, N), jnp.float32)
    bg = 0.1 * jax.random.normal(keys[2 * n_hidden + 1], (1, N), jnp.float32)

    x = jax.random.normal(keys[2 * n_hidden + 2], (B, input_dim), jnp.float32)
    Tn = jax.random.normal(keys[2 * n_hidden + 3], (B, N, 3, 3), jnp.float32)

    b_pred, gn = tbnn_forward(x, hidden_params, wg, bg, Tn,
                              block_b=block_b, stream_dtype=stream_dtype)
    jax.block_until_ready((b_pred, gn))

    b_ref, gn_ref = _ref_forward(x, hidden_params, wg, bg, Tn)
    assert b_pred.shape == (B, 3, 3) and gn.shape == (B, N)
    assert jnp.allclose(b_pred, b_ref, rtol=b_tol, atol=b_tol)
    assert jnp.allclose(gn, gn_ref, rtol=gn_tol, atol=gn_tol)


if __name__ == "__main__":
    key = jax.random.PRNGKey(0)
    k1, k2, k3 = jax.random.split(key, 3)

    # Small shapes consistent with the module's forward.
    # 1) f32 Tn streaming (exactness escape hatch), single grid step.
    _run_case(k1, B=8, input_dim=5, n_hidden=2, neurons=32, N=10, block_b=4096,
              stream_dtype=jnp.float32, b_tol=1e-5, gn_tol=1e-5)
    # 2) f32 streaming, batch tiling with a ragged (masked) last block and a
    #    >= 4-step grid (tile capped to 80 rows).
    _run_case(k2, B=300, input_dim=5, n_hidden=2, neurons=32, N=10, block_b=128,
              stream_dtype=jnp.float32, b_tol=1e-5, gn_tol=1e-5)
    # 3) default bf16 Tn streaming: gn stays f32-exact, b_pred tolerance loosened.
    _run_case(k3, B=300, input_dim=5, n_hidden=2, neurons=32, N=10, block_b=4096,
              stream_dtype=jnp.bfloat16, b_tol=5e-2, gn_tol=1e-5)

    print("KERNEL_OK")
</pallas_src>

<mosaic_0001>
module attributes {stable_mosaic.version = 11 : i64} {
  func.func @kernel(%arg0: i32, %arg1: memref<8x5xf32, #tpu.memory_space<vmem>>, %arg2: memref<5x32xf32, #tpu.memory_space<vmem>>, %arg3: memref<1x32xf32, #tpu.memory_space<vmem>>, %arg4: memref<32x32xf32, #tpu.memory_space<vmem>>, %arg5: memref<1x32xf32, #tpu.memory_space<vmem>>, %arg6: memref<32x10xf32, #tpu.memory_space<vmem>>, %arg7: memref<1x10xf32, #tpu.memory_space<vmem>>, %arg8: memref<10x90xf32, #tpu.memory_space<vmem>>, %arg9: memref<90x19xf32, #tpu.memory_space<vmem>>, %arg10: memref<10x19xf32, #tpu.memory_space<vmem>>, %arg11: memref<8x90xf32, #tpu.memory_space<vmem>>, %arg12: memref<8x19xf32, #tpu.memory_space<vmem>>) attributes {dimension_semantics = [#tpu.dimension_semantics<parallel>], iteration_bounds = array<i64: 1>, scalar_prefetch = 0 : i64, scratch_operands = 0 : i64, tpu.core_type = #tpu.core_type<tc>, window_params = [{transform_indices = @transform_0, window_bounds = array<i64: 8, 5>}, {pipeline_mode = #tpu.pipeline_mode<synchronous>, transform_indices = @transform_1, window_bounds = array<i64: 5, 32>}, {pipeline_mode = #tpu.pipeline_mode<synchronous>, transform_indices = @transform_2, window_bounds = array<i64: 1, 32>}, {pipeline_mode = #tpu.pipeline_mode<synchronous>, transform_indices = @transform_3, window_bounds = array<i64: 32, 32>}, {pipeline_mode = #tpu.pipeline_mode<synchronous>, transform_indices = @transform_4, window_bounds = array<i64: 1, 32>}, {pipeline_mode = #tpu.pipeline_mode<synchronous>, transform_indices = @transform_5, window_bounds = array<i64: 32, 10>}, {pipeline_mode = #tpu.pipeline_mode<synchronous>, transform_indices = @transform_6, window_bounds = array<i64: 1, 10>}, {pipeline_mode = #tpu.pipeline_mode<synchronous>, transform_indices = @transform_7, window_bounds = array<i64: 10, 90>}, {pipeline_mode = #tpu.pipeline_mode<synchronous>, transform_indices = @transform_8, window_bounds = array<i64: 90, 19>}, {pipeline_mode = #tpu.pipeline_mode<synchronous>, transform_indices = @transform_9, window_bounds = array<i64: 10, 19>}, {transform_indices = @transform_10, window_bounds = array<i64: 8, 90>}, {transform_indices = @transform_11, window_bounds = array<i64: 8, 19>}]} {
    %c0 = arith.constant 0 : index
    %c0_0 = arith.constant 0 : index
    %0 = vector.load %arg1[%c0, %c0_0] : memref<8x5xf32, #tpu.memory_space<vmem>>, vector<8x5xf32>
    %c0_1 = arith.constant 0 : index
    %c0_2 = arith.constant 0 : index
    %1 = vector.load %arg2[%c0_1, %c0_2] : memref<5x32xf32, #tpu.memory_space<vmem>>, vector<5x32xf32>
    %c0_3 = arith.constant 0 : index
    %c0_4 = arith.constant 0 : index
    %2 = vector.load %arg3[%c0_3, %c0_4] : memref<1x32xf32, #tpu.memory_space<vmem>>, vector<1x32xf32>
    %cst = arith.constant dense<0.000000e+00> : vector<8x32xf32>
    %3 = tpu.matmul %0, %1, %cst {dimension_numbers = #tpu.dot_dimension_numbers<[1], [0], [0], [1], [0, 0, 1, 1], [], []>} : vector<8x5xf32>, vector<5x32xf32>, vector<8x32xf32> -> vector<8x32xf32>
    %4 = vector.broadcast %2 : vector<1x32xf32> to vector<8x32xf32>
    %5 = arith.addf %3, %4 : vector<8x32xf32>
    %cst_5 = arith.constant 0.000000e+00 : f32
    %6 = vector.broadcast %cst_5 : f32 to vector<8x32xf32>
    %7 = arith.maximumf %5, %6 : vector<8x32xf32>
    %c0_6 = arith.constant 0 : index
    %c0_7 = arith.constant 0 : index
    %8 = vector.load %arg4[%c0_6, %c0_7] : memref<32x32xf32, #tpu.memory_space<vmem>>, vector<32x32xf32>
    %c0_8 = arith.constant 0 : index
    %c0_9 = arith.constant 0 : index
    %9 = vector.load %arg5[%c0_8, %c0_9] : memref<1x32xf32, #tpu.memory_space<vmem>>, vector<1x32xf32>
    %cst_10 = arith.constant dense<0.000000e+00> : vector<8x32xf32>
    %10 = tpu.matmul %7, %8, %cst_10 {dimension_numbers = #tpu.dot_dimension_numbers<[1], [0], [0], [1], [0, 0, 1, 1], [], []>} : vector<8x32xf32>, vector<32x32xf32>, vector<8x32xf32> -> vector<8x32xf32>
    %11 = vector.broadcast %9 : vector<1x32xf32> to vector<8x32xf32>
    %12 = arith.addf %10, %11 : vector<8x32xf32>
    %cst_11 = arith.constant 0.000000e+00 : f32
    %13 = vector.broadcast %cst_11 : f32 to vector<8x32xf32>
    %14 = arith.maximumf %12, %13 : vector<8x32xf32>
    %c0_12 = arith.constant 0 : index
    %c0_13 = arith.constant 0 : index
    %15 = vector.load %arg6[%c0_12, %c0_13] : memref<32x10xf32, #tpu.memory_space<vmem>>, vector<32x10xf32>
    %cst_14 = arith.constant dense<0.000000e+00> : vector<8x10xf32>
    %16 = tpu.matmul %14, %15, %cst_14 {dimension_numbers = #tpu.dot_dimension_numbers<[1], [0], [0], [1], [0, 0, 1, 1], [], []>} : vector<8x32xf32>, vector<32x10xf32>, vector<8x10xf32> -> vector<8x10xf32>
    %c0_15 = arith.constant 0 : index
    %c0_16 = arith.constant 0 : index
    %17 = vector.load %arg7[%c0_15, %c0_16] : memref<1x10xf32, #tpu.memory_space<vmem>>, vector<1x10xf32>
    %18 = vector.broadcast %17 : vector<1x10xf32> to vector<8x10xf32>
    %19 = arith.addf %16, %18 : vector<8x10xf32>
    %c0_17 = arith.constant 0 : index
    %c0_18 = arith.constant 0 : index
    %20 = vector.load %arg11[%c0_17, %c0_18] : memref<8x90xf32, #tpu.memory_space<vmem>>, vector<8x90xf32>
    %c0_19 = arith.constant 0 : index
    %c0_20 = arith.constant 0 : index
    %21 = vector.load %arg8[%c0_19, %c0_20] : memref<10x90xf32, #tpu.memory_space<vmem>>, vector<10x90xf32>
    %cst_21 = arith.constant dense<0.000000e+00> : vector<8x90xf32>
    %22 = tpu.matmul %19, %21, %cst_21 {dimension_numbers = #tpu.dot_dimension_numbers<[1], [0], [0], [1], [0, 0, 1, 1], [], []>} : vector<8x10xf32>, vector<10x90xf32>, vector<8x90xf32> -> vector<8x90xf32>
    %23 = arith.mulf %22, %20 : vector<8x90xf32>
    %c0_22 = arith.constant 0 : index
    %c0_23 = arith.constant 0 : index
    %24 = vector.load %arg9[%c0_22, %c0_23] : memref<90x19xf32, #tpu.memory_space<vmem>>, vector<90x19xf32>
    %cst_24 = arith.constant dense<0.000000e+00> : vector<8x19xf32>
    %25 = tpu.matmul %23, %24, %cst_24 {dimension_numbers = #tpu.dot_dimension_numbers<[1], [0], [0], [1], [0, 0, 1, 1], [], []>} : vector<8x90xf32>, vector<90x19xf32>, vector<8x19xf32> -> vector<8x19xf32>
    %c0_25 = arith.constant 0 : index
    %c0_26 = arith.constant 0 : index
    %26 = vector.load %arg10[%c0_25, %c0_26] : memref<10x19xf32, #tpu.memory_space<vmem>>, vector<10x19xf32>
    %cst_27 = arith.constant dense<0.000000e+00> : vector<8x19xf32>
    %27 = tpu.matmul %19, %26, %cst_27 {dimension_numbers = #tpu.dot_dimension_numbers<[1], [0], [0], [1], [0, 0, 1, 1], [], []>} : vector<8x10xf32>, vector<10x19xf32>, vector<8x19xf32> -> vector<8x19xf32>
    %28 = arith.addf %25, %27 : vector<8x19xf32>
    %c0_28 = arith.constant 0 : index
    %c0_29 = arith.constant 0 : index
    %29 = vector.load %arg12[%c0_28, %c0_29] : memref<8x19xf32, #tpu.memory_space<vmem>>, vector<8x19xf32>
    tpu.vector_store %arg12[%c0_28, %c0_29], %28 {strides = array<i32>} : memref<8x19xf32, #tpu.memory_space<vmem>>, vector<8x19xf32>,
    return
  }
  func.func @transform_0(%arg0: i32) -> (i32, i32) {
    %c0_i32 = arith.constant 0 : i32
    %c0_i32_0 = arith.constant 0 : i32
    return %arg0, %c0_i32 : i32, i32
  }
  func.func @transform_1(%arg0: i32) -> (i32, i32) {
    %c0_i32 = arith.constant 0 : i32
    %c0_i32_0 = arith.constant 0 : i32
    %c0_i32_1 = arith.constant 0 : i32
    return %c0_i32, %c0_i32_0 : i32, i32
  }
  func.func @transform_2(%arg0: i32) -> (i32, i32) {
    %c0_i32 = arith.constant 0 : i32
    %c0_i32_0 = arith.constant 0 : i32
    %c0_i32_1 = arith.constant 0 : i32
    return %c0_i32, %c0_i32_0 : i32, i32
  }
  func.func @transform_3(%arg0: i32) -> (i32, i32) {
    %c0_i32 = arith.constant 0 : i32
    %c0_i32_0 = arith.constant 0 : i32
    %c0_i32_1 = arith.constant 0 : i32
    return %c0_i32, %c0_i32_0 : i32, i32
  }
  func.func @transform_4(%arg0: i32) -> (i32, i32) {
    %c0_i32 = arith.constant 0 : i32
    %c0_i32_0 = arith.constant 0 : i32
    %c0_i32_1 = arith.constant 0 : i32
    return %c0_i32, %c0_i32_0 : i32, i32
  }
  func.func @transform_5(%arg0: i32) -> (i32, i32) {
    %c0_i32 = arith.constant 0 : i32
    %c0_i32_0 = arith.constant 0 : i32
    %c0_i32_1 = arith.constant 0 : i32
    return %c0_i32, %c0_i32_0 : i32, i32
  }
  func.func @transform_6(%arg0: i32) -> (i32, i32) {
    %c0_i32 = arith.constant 0 : i32
    %c0_i32_0 = arith.constant 0 : i32
    %c0_i32_1 = arith.constant 0 : i32
    return %c0_i32, %c0_i32_0 : i32, i32
  }
  func.func @transform_7(%arg0: i32) -> (i32, i32) {
    %c0_i32 = arith.constant 0 : i32
    %c0_i32_0 = arith.constant 0 : i32
    %c0_i32_1 = arith.constant 0 : i32
    return %c0_i32, %c0_i32_0 : i32, i32
  }
  func.func @transform_8(%arg0: i32) -> (i32, i32) {
    %c0_i32 = arith.constant 0 : i32
    %c0_i32_0 = arith.constant 0 : i32
    %c0_i32_1 = arith.constant 0 : i32
    return %c0_i32, %c0_i32_0 : i32, i32
  }
  func.func @transform_9(%arg0: i32) -> (i32, i32) {
    %c0_i32 = arith.constant 0 : i32
    %c0_i32_0 = arith.constant 0 : i32
    %c0_i32_1 = arith.constant 0 : i32
    return %c0_i32, %c0_i32_0 : i32, i32
  }
  func.func @transform_10(%arg0: i32) -> (i32, i32) {
    %c0_i32 = arith.constant 0 : i32
    %c0_i32_0 = arith.constant 0 : i32
    return %arg0, %c0_i32 : i32, i32
  }
  func.func @transform_11(%arg0: i32) -> (i32, i32) {
    %c0_i32 = arith.constant 0 : i32
    %c0_i32_0 = arith.constant 0 : i32
    return %arg0, %c0_i32 : i32, i32
  }
}

</mosaic_0001>

<bundles_post_ra>
// kernel: tpu_custom_call.1
= control target key start
LH: loop header
LB: loop body
LE: loop exit
PB: predicated region body
PF: predicated region fallthrough
CT: control target
= control target key end

     0   :  { %vm52_vm0 = vcmask 1044480   ;;  %v740_v2 = vmov 0.0   ;;  %vm741_vm1 = vmmov 0   ;;  %vm48_vm2 = vcmask 39936   ;;  %s944_s0 = inlined_call_operand.vmem [shape: f32[8,5], index: 0, kind: input, shape index: {}]   ;;  %s945_s1 = inlined_call_operand.vmem [shape: f32[5,32], index: 1, kind: input, shape index: {}]   ;;  %s946_s2 = inlined_call_operand.vmem [shape: f32[1,32], index: 2, kind: input, shape index: {}]   ;;  %s947_s3 = inlined_call_operand.vmem [shape: f32[32,32], index: 3, kind: input, shape index: {}]   ;;  %s948_s4 = inlined_call_operand.vmem [shape: f32[1,32], index: 4, kind: input, shape index: {}]   ;;  %s949_s5 = inlined_call_operand.vmem [shape: f32[32,10], index: 5, kind: input, shape index: {}]   ;;  %s950_s6 = inlined_call_operand.vmem [shape: f32[1,10], index: 6, kind: input, shape index: {}]   ;;  %s951_s7 = inlined_call_operand.vmem [shape: f32[10,90], index: 7, kind: input, shape index: {}]   ;;  %s952_s8 = inlined_call_operand.vmem [shape: f32[90,19], index: 8, kind: input, shape index: {}]   ;;  %s953_s9 = inlined_call_operand.vmem [shape: f32[10,19], index: 9, kind: input, shape index: {}]   ;;  %s954_s10 = inlined_call_operand.vmem [shape: f32[8,90], index: 10, kind: input, shape index: {}]   ;;  %s955_s11 = inlined_call_operand.hbm [shape: f32[8,19], index: 11, kind: output, shape index: {}]  }
   0x1   :  { %v40_v0 = vld [vmem:[%s945_s1] sm:$0x1f]  ;;  %603 = vmatprep.subr.mxu0 %v740_v2  ;;  %605 = vmatprep.mubr.msk.f32.mxu0 %vm741_vm1, %v740_v2  ;;  %v128_v4 = vld [vmem:[%s947_s3 + $0x8] sm:$0xff]  ;;  %v742_v5 = vmov 0.0|0.0  }
   0x2   :  { %v39_v1 = vld [vmem:[%s944_s0] sm:$0xff]  ;;  %604 = vmatpush3.msk.msra.mxu0 %vm52_vm0, %v40_v0  ;;  %671 = vmatprep.subr.bf16.mxu1 %v742_v5 }
   0x3   :  { %v127_v3 = vld [vmem:[%s947_s3] sm:$0xff] }
   0x4   :  { %v672_v6 = vpack.c.bf16 %v128_v4, %v127_v3 }
   0x5   :  { %16 = vsyncpa [#allocation3], 0  ;;  %606 = vmatmul.mubr.msk.f32.vlgmr.msra.gmra.mrb[0].mxu0 %vm48_vm2, %v39_v1  ;;  %616 = vmatprep.mubr.msk.f32.mxu1 %vm741_vm1, %v740_v2  ;;  %v129_v7 = vld [vmem:[%s947_s3 + $0x10] sm:$0xff]  ;;  %v130_v8 = vld [vmem:[%s947_s3 + $0x18] sm:$0xff]  ;;  %vm138_vm3 = vcmask 261120   ;;  %vm304_vm4 = vcmask 1041408  }
   0x6   :  { %673 = vmatpush3.bf16.msra.mxu1 %v672_v6  ;;  %691 = vmatprep.subr.bf16.mxu0 %v742_v5  ;;  %v675_v9 = vpack.c.bf16 %v130_v8, %v129_v7  ;;  %v559_v10 = vld [vmem:[%s946_s2] ss:$0 sm:$0xff]  ;;  %v214_v12 = vld [vmem:[%s949_s5 + $0x8] sm:$0xff]  ;;  %v215_v18 = vld [vmem:[%s949_s5 + $0x10] sm:$0xff]  ;;  %vm743_vm5 = vmmov 1   ;;  %vm300_vm7 = vcmask 80896  }
   0x7   :  { %674 = vmatprep.subr.bf16.mxu1 %v742_v5  ;;  %668 = vmatprep.mubr.msk.f32.mxu0 %vm741_vm1, %v740_v2  ;;  %v213_v11 = vld [vmem:[%s949_s5] sm:$0xff]  ;;  %v216_v19 = vld [vmem:[%s949_s5 + $0x18] sm:$0xff]  ;;  %v299_v23 = vld [vmem:[%s951_s7 + $0x8] sm:$0x3]  ;;  %vm466_vm8 = vcmask 736256   ;;  %s744_s23 = smov [#allocation2]  }
   0x8   :  { %v678_v16 = vpack.c.bf16 %v214_v12, %v213_v11  ;;  %v681_v20 = vpack.c.bf16 %v216_v19, %v215_v18  ;;  %v562_v21 = vld [vmem:[%s948_s4] ss:$0 sm:$0xff]  ;;  %vm863_vm6 = vmpackc.low %vm304_vm4, %vm743_vm5  ;;  %v380_v31 = vld [vmem:[%s952_s8 + $0x8] sm:$0xff]  ;;  %s551_s24 = sshll.u32 %s744_s23, 4  ;;  %vm543_vm9 = vcmask 154624   ;;  %s552_s24 = int_to_ptr.vmem [resolvable:$true] %s551_s24 }
   0x9   :  { %v298_v22 = vld [vmem:[%s951_s7] sm:$0xff]  ;;  %v381_v32 = vld [vmem:[%s952_s8 + $0x10] sm:$0xff]  ;;  %v382_v34 = vld [vmem:[%s952_s8 + $0x18] sm:$0xff]  ;;  %p721_p1 = scmp.lt.s32.totalorder %s552_s24, %s552_s24 }
   0xa   :  { %676 = vmatpush3.bf16.msra.mxu1 %v675_v9  ;;  %v684_v27 = vpack.c.bf16 %v299_v23, %v298_v22  ;;  %v379_v30 = vld [vmem:[%s952_s8] sm:$0xff]  ;;  %v695_v35 = vpack.c.bf16 %v382_v34, %v381_v32  ;;  %v384_v37 = vld [vmem:[%s952_s8 + $0x28] sm:$0xff]  ;;  %v385_v39 = vld [vmem:[%s952_s8 + $0x30] sm:$0xff] }
   0xb   :  { %677 = vmatprep.subr.bf16.mxu1 %v742_v5  ;;  %v692_v33 = vpack.c.bf16 %v380_v31, %v379_v30  ;;  %v383_v36 = vld [vmem:[%s952_s8 + $0x20] sm:$0xff]  ;;  %v386_v40 = vld [vmem:[%s952_s8 + $0x38] sm:$0xff]  ;;  %v388_v43 = vld [vmem:[%s952_s8 + $0x48] sm:$0xff] }
   0xc   :  { %v698_v38 = vpack.c.bf16 %v384_v37, %v383_v36  ;;  %v701_v41 = vpack.c.bf16 %v386_v40, %v385_v39  ;;  %v387_v42 = vld [vmem:[%s952_s8 + $0x40] sm:$0xff]  ;;  %v392_v46 = vld [vmem:[%s953_s9 + $0x8] sm:$0x3]  ;;  %v389_v52 = vld [vmem:[%s952_s8 + $0x50] sm:$0xff] }
   0xd   :  { %693 = vmatpush3.bf16.msra.mxu0 %v692_v33  ;;  %v704_v44 = vpack.c.bf16 %v388_v43, %v387_v42  ;;  %v391_v45 = vld [vmem:[%s953_s9] sm:$0xff]  ;;  %v390_v53 = vld [vmem:[%s952_s8 + $0x58] sm:$0x3]  ;;  %s716_s8 = scalar_lea.vmem %s552_s24, 128 }
   0xe   :  { %694 = vmatprep.subr.bf16.mxu0 %v742_v5  ;;  %v564_v47 = vld [vmem:[%s950_s6] ss:$0 sm:$0xff]  ;;  %v688_v49 = vpack.c.bf16 %v392_v46, %v391_v45  ;;  %v707_v54 = vpack.c.bf16 %v390_v53, %v389_v52  ;;  %p717_p0 = scmp.ne.s32.totalorder %s552_s24, %s716_s8  ;;  %p722_p2 = scmp.lt.s32.totalorder %s716_s8, %s716_s8 }
   0xf   :  { %v297_v55 = vld [vmem:[%s954_s10] sm:$0xff] }
  0x10   :  { %p723_p3 = por %p722_p2, %p721_p1 }
  0x11   :  { %696 = vmatpush3.bf16.msra.mxu0 %v695_v35 }
  0x12   :  { %697 = vmatprep.subr.bf16.mxu0 %v742_v5  ;;  %p724_p4 = pnand %p723_p3, %p717_p0 }
  0x15   :  { %699 = vmatpush3.bf16.msra.mxu0 %v698_v38 }
  0x16   :  { %700 = vmatprep.subr.bf16.mxu0 %v742_v5 }
  0x19   :  { %702 = vmatpush3.bf16.msra.mxu0 %v701_v41 }
  0x1a   :  { %703 = vmatprep.subr.bf16.mxu0 %v742_v5 }
  0x1d   :  { %705 = vmatpush3.bf16.msra.mxu0 %v704_v44 }
  0x1e   :  { %706 = vmatprep.subr.bf16.mxu0 %v742_v5 }
  0x21   :  { %709 = vmatpush3.bf16.msk.msra.mxu0 %vm863_vm6, %v707_v54 }
  0xd8   :  { %v122_v13 = vpop.f32.mrb[0].mxu0 }
  0xd9   :  { %v123_v14 = vadd.f32 %v559_v10, %v122_v13  ;;  %v607_v15 = vpop.f32.mrb[1].mxu0 }
  0xdb   :  { %v126_v17 = vmax.f32 %v123_v14, 0.0 }
  0xdd   :  { %617 = vmatmul.mubr.msk.f32.vlgmr.msra.gmra.mrb[0].mxu1 %vm138_vm3, %v126_v17 }
  0xde   :  { %679 = vmatpush3.bf16.msra.mxu1 %v678_v16  ;;  %627 = vmatprep.mubr.msk.f32.mxu1 %vm741_vm1, %v740_v2 }
  0xdf   :  { %680 = vmatprep.subr.bf16.mxu1 %v742_v5 }
  0xe2   :  { %682 = vmatpush3.bf16.msra.mxu1 %v681_v20 }
  0xe3   :  { %683 = vmatprep.subr.bf16.mxu1 %v742_v5 }
 0x1b0   :  { %v208_v24 = vpop.f32.mrb[0].mxu1 }
 0x1b1   :  { %v209_v25 = vadd.f32 %v562_v21, %v208_v24  ;;  %v618_v26 = vpop.f32.mrb[1].mxu1 }
 0x1b3   :  { %v212_v28 = vmax.f32 %v209_v25, 0.0 }
 0x1b5   :  { %628 = vmatmul.mubr.msk.f32.vlgmr.msra.gmra.mrb[2].mxu1 %vm138_vm3, %v212_v28 }
 0x1b6   :  { %686 = vmatpush3.bf16.msk.msra.mxu1 %vm863_vm6, %v684_v27  ;;  %634 = vmatprep.mubr.msk.f32.mxu1 %vm741_vm1, %v740_v2 }
 0x1b7   :  { %687 = vmatprep.subr.bf16.mxu1 %v742_v5 }
 0x288   :  { %v293_v48 = vpop.f32.mrb[2].mxu1 }
 0x289   :  { %v294_v50 = vadd.f32 %v564_v47, %v293_v48  ;;  %v629_v51 = vpop.f32.mrb[3].mxu1 }
 0x28b   :  { %635 = vmatmul.mubr.msk.f32.vlgmr.msra.gmra.mrb[4].mxu1 %vm300_vm7, %v294_v50 }
 0x28c   :  { %690 = vmatpush3.bf16.msk.msra.mxu1 %vm863_vm6, %v688_v49  ;;  %641 = vmatprep.mubr.msk.f32.mxu1 %vm741_vm1, %v740_v2 }
 0x28f   :  { %642 = vmatmul.mubr.msk.f32.vlgmr.msra.gmra.mrb[6].mxu1 %vm300_vm7, %v294_v50 }
 0x35e   :  { %v374_v56 = vpop.f32.mrb[4].mxu1 }
 0x35f   :  { %v378_v57 = vmul.f32 %v374_v56, %v297_v55  ;;  %v636_v58 = vpop.f32.mrb[5].mxu1 }
 0x361   :  { %669 = vmatmul.mubr.msk.f32.vlgmr.msra.gmra.mrb[2].mxu0 %vm466_vm8, %v378_v57 }
 0x362   :  { %v462_v59 = vpop.f32.mrb[6].mxu1 }
 0x363   :  { %v643_v60 = vpop.f32.mrb[7].mxu1 }
 0x434   :  { %v539_v61 = vpop.f32.mrb[2].mxu0 }
 0x435   :  { %v540_v62 = vadd.f32 %v539_v61, %v462_v59  ;;  %v670_v63 = vpop.f32.mrb[3].mxu0 }
 0x437   :  { %544 = vst.msk [vmem:[#allocation2] sm:$0xff] %vm543_vm9, %v540_v62 }
 0x438   :  { %727 = shalt.err (!%p724_p4)
}
 0x439   :  { %s728_s1 = scalar_lea.hbm %s955_s11, 128 }
 0x43a   :  { %p729_p5 = scmp.ne.s32.totalorder %s955_s11, %s728_s1  ;;  %p732_p6 = scmp.lt.u32.totalorder %s728_s1, %s955_s11 }
 0x43c   :  { %p734_p7 = pnand %p732_p6, %p729_p5 }
 0x43e   :  { %737 = shalt.err (!%p734_p7)
}
 0x43f   :  { %554 = dma.vmem_to_hbm [thread:$0]  %s552_s24, 128, %s955_s11, [#allocation3]  }
 0x440   :  { %738 = dma.done.wait [#allocation3], 128  }
 0x441   :  { %739 = vsyncadd [#allocation3], 4294967168 }
 0x442   :  { %558 = vsyncpa [#allocation3], 1 }

</bundles_post_ra>
